<compile_context>
chip_gen: v6e
topology: v6e:2x2x1
jax: 0.10.0
libtpu: 0.0.40
codegen_flags: <defaults>
</compile_context>

<pallas_src>
import math

import jax
import jax.numpy as jnp
from jax.experimental import pallas as pl
from jax.experimental.pallas import tpu as pltpu


def lrnet_kernel(x_ref, w_ref, b_ref, o_ref):
    # x_ref: (TB, L) VMEM     w_ref: (L, K) VMEM (resident)
    # b_ref: (1,)   SMEM      o_ref: (TB, K) VMEM
    y = jnp.dot(x_ref[...], w_ref[...], preferred_element_type=jnp.float32)
    o_ref[...] = (y + b_ref[0]).astype(o_ref.dtype)


def _round_up(n, m):
    return ((n + m - 1) // m) * m


def _vmem_capacity_bytes():
    try:
        return int(pltpu.get_tpu_info().vmem_capacity_bytes)
    except Exception:
        return 64 * 1024 * 1024        # conservative default (v7x per-core VMEM)


def _is_v5():
    try:
        return "v5" in jax.devices()[0].device_kind.lower()
    except Exception:
        return False


def _per_buffer_budget_bytes(vmem_cap):
    if _is_v5():
        # v5e HBM ~0.82 TB/s: 4-6 MiB blocks already amortize the ~0.35 us/step
        # cost; bigger tiles only add pipeline-fill latency.
        return 6 << 20
    # v6e (128 MiB VMEM) -> 16 MiB per x buffer, v7x (64 MiB VMEM) -> 8 MiB.
    return min(16 << 20, vmem_cap // 8)


def _choose_row_tile(n_rows, row_bytes, per_buf_budget):
    """Rows per block: as many as fit the per-buffer budget (the BlockSpec
    pipeline double-buffers it), sublane-aligned, but capped so the batch grid
    keeps >= 2 (ideally 4) steps while blocks stay multi-MiB (v7x megacore)."""
    tb = max(8, (per_buf_budget // row_bytes) // 8 * 8)
    if n_rows <= tb:
        return n_rows                  # single full-array block, no masking
    for parts, min_block_bytes in ((4, 4 << 20), (2, 2 << 20)):
        part = _round_up(pl.cdiv(n_rows, parts), 8)
        if part * row_bytes >= min_block_bytes:
            tb = min(tb, part)
            break
    return tb


def lrnet_forward(x, weight, bias):
    """x: (B, F); weight: (1, F) (= nn.Linear(F, 1).weight); bias: (1,).
    Returns (B, 1), matching LRNet.forward (no sigmoid)."""
    B, F = x.shape
    dtype = x.dtype
    itemsize = jnp.dtype(dtype).itemsize

    # ---- lane packing: k samples per 128-lane row (free row-major reshape) ----
    k = 1
    if F <= 128 and 128 % F == 0 and B % (128 // F) == 0:
        k = 128 // F
    L = k * F
    R = B // k
    xp = x.reshape(R, L)               # free: x is row-major contiguous

    # Fold the packing into a block-diagonal weight (L, k):
    #   w_sel[j*F + f, c] = weight[0, f] if j == c else 0
    # so (xp @ w_sel)[r, c] = dot(x[r*k + c, :], weight) for every sample.
    w_col = weight.reshape(1, F, 1).astype(dtype)
    if k == 1:
        w_sel = w_col.reshape(F, 1)
    else:
        w_sel = (jnp.eye(k, dtype=dtype)[:, None, :] * w_col).reshape(L, k)
    b_smem = bias.reshape(1).astype(jnp.float32)

    # ---- generation-aware block sizing --------------------------------------
    vmem_cap = _vmem_capacity_bytes()
    row_bytes = L * itemsize
    tb = _choose_row_tile(R, row_bytes, _per_buffer_budget_bytes(vmem_cap))
    grid = (pl.cdiv(R, tb),)

    # Raise the scoped VMEM limit to cover the double-buffered blocks, with
    # headroom below the physical per-core capacity (64 MiB on v7x).
    need = (2 * tb * row_bytes            # double-buffered x blocks
            + 2 * tb * k * itemsize       # double-buffered output blocks
            + 2 * L * k * itemsize        # resident weight
            + (1 << 20))                  # slack
    vmem_limit = int(min(vmem_cap - (2 << 20), max(need, 32 << 20)))

    out = pl.pallas_call(
        lrnet_kernel,
        out_shape=jax.ShapeDtypeStruct((R, k), dtype),
        grid_spec=pltpu.PrefetchScalarGridSpec(
            num_scalar_prefetch=0,
            grid=grid,
            in_specs=[
                # packed x: tiled over rows, full (packed) feature dim per block
                pl.BlockSpec((tb, L), lambda i: (i, 0)),
                # block-diagonal weight: constant index map -> resident in VMEM
                pl.BlockSpec((L, k), lambda i: (0, 0)),
                # bias: whole (1,) array in SMEM, read as a scalar
                pl.BlockSpec(memory_space=pltpu.MemorySpace.SMEM),
            ],
            out_specs=pl.BlockSpec((tb, k), lambda i: (i, 0)),
        ),
        compiler_params=pltpu.CompilerParams(
            # Batch tiles are independent -> v7x shards them across its 2 TCs.
            dimension_semantics=("parallel",),
            vmem_limit_bytes=vmem_limit,
        ),
    )(xp, w_sel, b_smem)

    # (R, k) row-major flattening is exactly sample order r*k + c -> free reshape.
    return out.reshape(B, 1)


def init_lrnet_params(key, num_feats):
    """torch.nn.Linear(num_feats, 1) default init: U(+-1/sqrt(num_feats))."""
    kw, kb = jax.random.split(key)
    bound = 1.0 / math.sqrt(num_feats)
    weight = jax.random.uniform(kw, (1, num_feats), jnp.float32, -bound, bound)
    bias = jax.random.uniform(kb, (1,), jnp.float32, -bound, bound)
    return weight, bias


if __name__ == "__main__":
    key = jax.random.PRNGKey(0)
    k_x, k_p = jax.random.split(key)

    batch = 32
    num_feats = 32                      # options['num_feats']

    x = jax.random.normal(k_x, (batch, num_feats), dtype=jnp.float32)
    weight, bias = init_lrnet_params(k_p, num_feats)

    out = jax.block_until_ready(lrnet_forward(x, weight, bias))
    ref = jnp.sum(x * weight, axis=-1, keepdims=True) + bias
    assert out.shape == (batch, 1)
    assert jnp.allclose(out, ref, atol=1e-4, rtol=1e-4)

    # Also exercise the unpacked fallback path (B not divisible by 128 // F).
    x2 = jax.random.normal(k_x, (10, num_feats), dtype=jnp.float32)
    out2 = jax.block_until_ready(lrnet_forward(x2, weight, bias))
    ref2 = jnp.sum(x2 * weight, axis=-1, keepdims=True) + bias
    assert out2.shape == (10, 1)
    assert jnp.allclose(out2, ref2, atol=1e-4, rtol=1e-4)

    print("KERNEL_OK")
</pallas_src>

<mosaic_0001>
module attributes {stable_mosaic.version = 11 : i64} {
  func.func @lrnet_kernel(%arg0: i32, %arg1: memref<8x128xf32, #tpu.memory_space<vmem>>, %arg2: memref<128x4xf32, #tpu.memory_space<vmem>>, %arg3: memref<1xf32, #tpu.memory_space<smem>>, %arg4: memref<8x4xf32, #tpu.memory_space<vmem>>) attributes {dimension_semantics = [#tpu.dimension_semantics<parallel>], iteration_bounds = array<i64: 1>, scalar_prefetch = 0 : i64, scratch_operands = 0 : i64, tpu.core_type = #tpu.core_type<tc>, window_params = [{transform_indices = @transform_0, window_bounds = array<i64: 8, 128>}, {pipeline_mode = #tpu.pipeline_mode<synchronous>, transform_indices = @transform_1, window_bounds = array<i64: 128, 4>}, {transform_indices = @transform_2, window_bounds = array<i64: 1>}, {transform_indices = @transform_3, window_bounds = array<i64: 8, 4>}]} {
    %c0 = arith.constant 0 : index
    %c0_0 = arith.constant 0 : index
    %0 = vector.load %arg1[%c0, %c0_0] : memref<8x128xf32, #tpu.memory_space<vmem>>, vector<8x128xf32>
    %c0_1 = arith.constant 0 : index
    %c0_2 = arith.constant 0 : index
    %1 = vector.load %arg2[%c0_1, %c0_2] : memref<128x4xf32, #tpu.memory_space<vmem>>, vector<128x4xf32>
    %cst = arith.constant dense<0.000000e+00> : vector<8x4xf32>
    %2 = tpu.matmul %0, %1, %cst {dimension_numbers = #tpu.dot_dimension_numbers<[1], [0], [0], [1], [0, 0, 1, 1], [], []>} : vector<8x128xf32>, vector<128x4xf32>, vector<8x4xf32> -> vector<8x4xf32>
    %c0_3 = arith.constant 0 : index
    %3 = memref.load %arg3[%c0_3] : memref<1xf32, #tpu.memory_space<smem>>
    %4 = vector.broadcast %3 : f32 to vector<8x4xf32>
    %5 = arith.addf %2, %4 : vector<8x4xf32>
    %c0_4 = arith.constant 0 : index
    %c0_5 = arith.constant 0 : index
    %6 = vector.load %arg4[%c0_4, %c0_5] : memref<8x4xf32, #tpu.memory_space<vmem>>, vector<8x4xf32>
    tpu.vector_store %arg4[%c0_4, %c0_5], %5 {strides = array<i32>} : memref<8x4xf32, #tpu.memory_space<vmem>>, vector<8x4xf32>,
    return
  }
  func.func @transform_0(%arg0: i32) -> (i32, i32) {
    %c0_i32 = arith.constant 0 : i32
    %c0_i32_0 = arith.constant 0 : i32
    return %arg0, %c0_i32 : i32, i32
  }
  func.func @transform_1(%arg0: i32) -> (i32, i32) {
    %c0_i32 = arith.constant 0 : i32
    %c0_i32_0 = arith.constant 0 : i32
    %c0_i32_1 = arith.constant 0 : i32
    return %c0_i32, %c0_i32_0 : i32, i32
  }
  func.func @transform_2(%arg0: i32) -> i32 {
    %c0_i32 = arith.constant 0 : i32
    %c0_i32_0 = arith.constant 0 : i32
    return %c0_i32 : i32
  }
  func.func @transform_3(%arg0: i32) -> (i32, i32) {
    %c0_i32 = arith.constant 0 : i32
    %c0_i32_0 = arith.constant 0 : i32
    return %arg0, %c0_i32 : i32, i32
  }
}

</mosaic_0001>

<bundles_post_ra>
// kernel: tpu_custom_call.1
= control target key start
LH: loop header
LB: loop body
LE: loop exit
PB: predicated region body
PF: predicated region fallthrough
CT: control target
= control target key end

     0   :  { %v164_v0 = vmov 0.0   ;;  %vm165_vm0 = vmmov 0   ;;  %vm104_vm1 = vcmask 31744   ;;  %s243_s1 = inlined_call_operand.vmem [shape: f32[128,4], index: 1, kind: input, shape index: {}]   ;;  %s244_s0 = inlined_call_operand.vmem [shape: f32[8,128], index: 0, kind: input, shape index: {}]   ;;  %s245_s2 = inlined_call_operand.<no memory space> [shape: f32[1], index: 2, kind: input, shape index: {}]   ;;  %s246_s3 = inlined_call_operand.vmem [shape: f32[8,4], index: 3, kind: output, shape index: {}]  }
   0x1   :  { %127 = vmatprep.subr.mxu0 %v164_v0  ;;  %v31_v1 = vld [vmem:[%s243_s1 + $0x78] sm:$0xff]  ;;  %v30_v2 = vld [vmem:[%s243_s1 + $0x70] sm:$0xff]  ;;  %159 = vmatprep.mubr.msk.f32.mxu0 %vm165_vm0, %v164_v0  ;;  %v29_v3 = vld [vmem:[%s243_s1 + $0x68] sm:$0xff]  ;;  %v33_v18 = vstv %s245_s2 }
   0x2   :  { %128 = vmatpush3.msra.mxu0 %v31_v1  ;;  %v28_v4 = vld [vmem:[%s243_s1 + $0x60] sm:$0xff]  ;;  %v27_v5 = vld [vmem:[%s243_s1 + $0x58] sm:$0xff]  ;;  %v26_v6 = vld [vmem:[%s243_s1 + $0x50] sm:$0xff] }
   0x3   :  { %129 = vmatprep.subr.mxu0 %v164_v0  ;;  %v25_v7 = vld [vmem:[%s243_s1 + $0x48] sm:$0xff]  ;;  %v24_v8 = vld [vmem:[%s243_s1 + $0x40] sm:$0xff]  ;;  %v23_v9 = vld [vmem:[%s243_s1 + $0x38] sm:$0xff] }
   0x4   :  { %130 = vmatpush3.msra.mxu0 %v30_v2  ;;  %v22_v10 = vld [vmem:[%s243_s1 + $0x30] sm:$0xff]  ;;  %v21_v11 = vld [vmem:[%s243_s1 + $0x28] sm:$0xff]  ;;  %v20_v12 = vld [vmem:[%s243_s1 + $0x20] sm:$0xff] }
   0x5   :  { %131 = vmatprep.subr.mxu0 %v164_v0  ;;  %v19_v13 = vld [vmem:[%s243_s1 + $0x18] sm:$0xff]  ;;  %v18_v14 = vld [vmem:[%s243_s1 + $0x10] sm:$0xff]  ;;  %v17_v15 = vld [vmem:[%s243_s1 + $0x8] sm:$0xff] }
   0x6   :  { %132 = vmatpush3.msra.mxu0 %v29_v3  ;;  %v16_v16 = vld [vmem:[%s243_s1] sm:$0xff] }
   0x7   :  { %133 = vmatprep.subr.mxu0 %v164_v0  ;;  %v15_v17 = vld [vmem:[%s244_s0] sm:$0xff] }
   0x8   :  { %134 = vmatpush3.msra.mxu0 %v28_v4 }
   0x9   :  { %135 = vmatprep.subr.mxu0 %v164_v0 }
   0xa   :  { %136 = vmatpush3.msra.mxu0 %v27_v5 }
   0xb   :  { %137 = vmatprep.subr.mxu0 %v164_v0 }
   0xc   :  { %138 = vmatpush3.msra.mxu0 %v26_v6 }
   0xd   :  { %139 = vmatprep.subr.mxu0 %v164_v0 }
   0xe   :  { %140 = vmatpush3.msra.mxu0 %v25_v7 }
   0xf   :  { %141 = vmatprep.subr.mxu0 %v164_v0 }
  0x10   :  { %142 = vmatpush3.msra.mxu0 %v24_v8 }
  0x11   :  { %143 = vmatprep.subr.mxu0 %v164_v0 }
  0x12   :  { %144 = vmatpush3.msra.mxu0 %v23_v9 }
  0x13   :  { %145 = vmatprep.subr.mxu0 %v164_v0 }
  0x14   :  { %146 = vmatpush3.msra.mxu0 %v22_v10 }
  0x15   :  { %147 = vmatprep.subr.mxu0 %v164_v0 }
  0x16   :  { %148 = vmatpush3.msra.mxu0 %v21_v11 }
  0x17   :  { %149 = vmatprep.subr.mxu0 %v164_v0 }
  0x18   :  { %150 = vmatpush3.msra.mxu0 %v20_v12 }
  0x19   :  { %151 = vmatprep.subr.mxu0 %v164_v0 }
  0x1a   :  { %152 = vmatpush3.msra.mxu0 %v19_v13 }
  0x1b   :  { %153 = vmatprep.subr.mxu0 %v164_v0 }
  0x1c   :  { %154 = vmatpush3.msra.mxu0 %v18_v14 }
  0x1d   :  { %155 = vmatprep.subr.mxu0 %v164_v0 }
  0x1e   :  { %156 = vmatpush3.msra.mxu0 %v17_v15 }
  0x1f   :  { %157 = vmatprep.subr.mxu0 %v164_v0 }
  0x20   :  { %158 = vmatpush3.msra.mxu0 %v16_v16 }
  0x21   :  { %160 = vmatmul.mubr.f32.vlgmr.msra.gmra.mxu0 %v15_v17 }
  0xe1   :  { %v100_v19 = vpop.f32.mrf.mxu0 }
  0xe2   :  { %v101_v20 = vadd.f32 %v100_v19, %v33_v18 }
  0xe3   :  { %v161_v21 = vpop.f32.mrf.mxu0 }
  0xe4   :  { %105 = vst.msk [vmem:[%s246_s3] sm:$0xff] %vm104_vm1, %v101_v20 }

</bundles_post_ra>
